<compile_context>
chip_gen: v7x
topology: tpu7x:2x2x1
jax: 0.10.0
libtpu: 0.0.40
codegen_flags: <defaults>
</compile_context>

<pallas_src>
import jax
import jax.numpy as jnp
from jax import lax
from jax.experimental import pallas as pl
from jax.experimental.pallas import tpu as pltpu


def _round_up(x: int, m: int) -> int:
    return ((x + m - 1) // m) * m


def _kernel_single_k(x_ref, w_ref, b_ref, o_ref):
    """Single K-tile path: no accumulator scratch, no k grid axis.

    x_ref: (tm, K)   w_ref: (tn, K)   b_ref: (1, tn)   o_ref: (tm, tn)
    Contract dim 1 of x with dim 1 of w (i.e. x @ w.T) directly on the MXU.
    """
    acc = lax.dot_general(
        x_ref[...],
        w_ref[...],
        dimension_numbers=(((1,), (1,)), ((), ())),
        preferred_element_type=jnp.float32,
    )
    # Reference module adds bias twice (inside F.linear and again after reduce).
    o_ref[...] = (acc + 2.0 * b_ref[...].astype(jnp.float32)).astype(o_ref.dtype)


def _kernel_multi_k(x_ref, w_ref, b_ref, o_ref, acc_ref):
    """K-reduction path: f32 accumulator, init at k==0, finalize (+2*bias) at last k."""
    k = pl.program_id(2)

    @pl.when(k == 0)
    def _():
        acc_ref[...] = jnp.zeros_like(acc_ref)

    acc_ref[...] += lax.dot_general(
        x_ref[...],
        w_ref[...],
        dimension_numbers=(((1,), (1,)), ((), ())),
        preferred_element_type=jnp.float32,
    )

    @pl.when(k == pl.num_programs(2) - 1)
    def _():
        o_ref[...] = (
            acc_ref[...] + 2.0 * b_ref[...].astype(jnp.float32)
        ).astype(o_ref.dtype)


def row_parallel_linear(
    x,
    weight,
    bias,
    *,
    tm: int = 512,
    tn: int = 512,
    tk: int = 1024,
    compute_dtype=None,
):
    """y = x @ weight.T + 2*bias  (world_size == 1 RowParallelLinear forward).

    x:      (..., in_features)
    weight: (out_features, in_features)   -- native PyTorch layout, NOT transposed
    bias:   (out_features,)
    compute_dtype: optional dtype (e.g. jnp.bfloat16) for the MXU operands;
                   accumulation stays f32 regardless.
    returns (..., out_features)
    """
    *lead, K = x.shape
    N, K_w = weight.shape
    assert K == K_w, (K, K_w)

    out_dtype = x.dtype
    x2d = x.reshape(-1, K)
    M = x2d.shape[0]

    if compute_dtype is not None:
        x2d = x2d.astype(compute_dtype)
        weight = weight.astype(compute_dtype)

    # Clamp tile sizes to the (alignment-rounded) problem size so small shapes
    # don't force huge padding, while big shapes get MXU/VMEM-filling tiles.
    tm = min(tm, _round_up(M, 8))      # sublane alignment
    tn = min(tn, _round_up(N, 128))    # lane alignment (lane-dense output)
    tk = min(tk, _round_up(K, 128))    # lane alignment of the contraction dim

    Mp, Np, Kp = _round_up(M, tm), _round_up(N, tn), _round_up(K, tk)

    # Zero-pad ragged shapes (zeros along K contribute nothing to the matmul;
    # padded M rows / N cols are sliced off after the call).
    if (Mp, Kp) != (M, K):
        x2d = jnp.pad(x2d, ((0, Mp - M), (0, Kp - K)))
    w2d = weight
    if (Np, Kp) != (N, K):
        w2d = jnp.pad(w2d, ((0, Np - N), (0, Kp - K)))
    b2d = bias.reshape(1, N)
    if Np != N:
        b2d = jnp.pad(b2d, ((0, 0), (0, Np - N)))

    nm, nn, nk = Mp // tm, Np // tn, Kp // tk

    in_isize = jnp.dtype(x2d.dtype).itemsize
    out_isize = jnp.dtype(out_dtype).itemsize
    cost = pl.CostEstimate(
        flops=2 * Mp * Np * Kp,
        transcendentals=0,
        bytes_accessed=(Mp * Kp + Np * Kp + Np) * in_isize + Mp * Np * out_isize,
    )

    # Double-buffered x / W / bias / out tiles (+ f32 accumulator when nk > 1).
    vmem_needed = 2 * (tm * tk + tn * tk + tn + tm * tn) * max(in_isize, out_isize)
    if nk > 1:
        vmem_needed += tm * tn * 4
    # Cap at 48 MiB so the budget also fits v7x's 64 MiB physical VMEM.
    vmem_limit = int(min(max(3 * vmem_needed, 16 * 2**20), 48 * 2**20))

    if nk == 1:
        kernel = _kernel_single_k
        grid = (nm, nn)
        in_specs = [
            pl.BlockSpec((tm, tk), lambda i, j: (i, 0)),   # x tile (tm, K)
            pl.BlockSpec((tn, tk), lambda i, j: (j, 0)),   # W tile (tn, K), native layout
            pl.BlockSpec((1, tn), lambda i, j: (0, j)),    # bias tile
        ]
        out_spec = pl.BlockSpec((tm, tn), lambda i, j: (i, j))
        scratch = []
        dims = ("parallel", "parallel")
    else:
        kernel = _kernel_multi_k
        grid = (nm, nn, nk)
        in_specs = [
            pl.BlockSpec((tm, tk), lambda i, j, k: (i, k)),  # x tile
            pl.BlockSpec((tn, tk), lambda i, j, k: (j, k)),  # W tile, native layout
            pl.BlockSpec((1, tn), lambda i, j, k: (0, j)),   # bias tile (k-independent)
        ]
        out_spec = pl.BlockSpec((tm, tn), lambda i, j, k: (i, j))
        scratch = [pltpu.VMEM((tm, tn), jnp.float32)]
        dims = ("parallel", "parallel", "arbitrary")

    out = pl.pallas_call(
        kernel,
        out_shape=jax.ShapeDtypeStruct((Mp, Np), out_dtype),
        grid_spec=pltpu.PrefetchScalarGridSpec(
            num_scalar_prefetch=0,
            grid=grid,
            in_specs=in_specs,
            out_specs=out_spec,
            scratch_shapes=scratch,
        ),
        compiler_params=pltpu.CompilerParams(
            dimension_semantics=dims,
            vmem_limit_bytes=vmem_limit,
        ),
        cost_estimate=cost,
    )(x2d, w2d, b2d)

    if (Mp, Np) != (M, N):
        out = out[:M, :N]
    return out.reshape(*lead, N)


if __name__ == "__main__":
    # Small, module-consistent shapes.
    batch, seq = 2, 8
    in_features, out_features = 256, 128

    key = jax.random.PRNGKey(0)
    kx, kw = jax.random.split(key)

    x = jax.random.normal(kx, (batch, seq, in_features), dtype=jnp.float32)

    # Deterministic parameter init (world_size == 1 path of
    # initialize_model_parallel_affine_weight_): xavier_normal on the full
    # (out_features, in_features) weight; bias zero-initialized (per __init__).
    fan_in, fan_out = in_features, out_features
    xavier_std = (2.0 / (fan_in + fan_out)) ** 0.5
    weight = xavier_std * jax.random.normal(
        kw, (out_features, in_features), dtype=jnp.float32
    )
    bias = jnp.zeros((out_features,), dtype=jnp.float32)

    # Pure-JAX reference of the exact module semantics (bias added twice).
    y_ref = x @ weight.T + 2.0 * bias

    # Path 1: default tiles -> K fits in one tile -> single-k kernel.
    y = row_parallel_linear(x, weight, bias)
    y = jax.block_until_ready(y)
    assert y.shape == (batch, seq, out_features), y.shape
    assert jnp.allclose(y, y_ref, atol=1e-4, rtol=1e-4), "mismatch (single-k path)"

    # Path 2: force a K reduction (tk < K) -> multi-k accumulator kernel.
    y2 = row_parallel_linear(x, weight, bias, tk=128)
    y2 = jax.block_until_ready(y2)
    assert jnp.allclose(y2, y_ref, atol=1e-4, rtol=1e-4), "mismatch (multi-k path)"

    print("KERNEL_OK")
</pallas_src>

<mosaic_0001>
module attributes {stable_mosaic.version = 11 : i64} {
  func.func @_kernel_single_k(%arg0: i32, %arg1: i32, %arg2: memref<16x256xf32, #tpu.memory_space<vmem>>, %arg3: memref<128x256xf32, #tpu.memory_space<vmem>>, %arg4: memref<1x128xf32, #tpu.memory_space<vmem>>, %arg5: memref<16x128xf32, #tpu.memory_space<vmem>>) attributes {dimension_semantics = [#tpu.dimension_semantics<parallel>, #tpu.dimension_semantics<parallel>], iteration_bounds = array<i64: 1, 1>, scalar_prefetch = 0 : i64, scratch_operands = 0 : i64, tpu.core_type = #tpu.core_type<tc>, window_params = [{transform_indices = @transform_0, window_bounds = array<i64: 16, 256>}, {transform_indices = @transform_1, window_bounds = array<i64: 128, 256>}, {transform_indices = @transform_2, window_bounds = array<i64: 1, 128>}, {transform_indices = @transform_3, window_bounds = array<i64: 16, 128>}]} {
    %c0 = arith.constant 0 : index
    %c0_0 = arith.constant 0 : index
    %0 = vector.load %arg2[%c0, %c0_0] : memref<16x256xf32, #tpu.memory_space<vmem>>, vector<16x256xf32>
    %c0_1 = arith.constant 0 : index
    %c0_2 = arith.constant 0 : index
    %1 = vector.load %arg3[%c0_1, %c0_2] : memref<128x256xf32, #tpu.memory_space<vmem>>, vector<128x256xf32>
    %cst = arith.constant dense<0.000000e+00> : vector<16x128xf32>
    %2 = tpu.matmul %0, %1, %cst {dimension_numbers = #tpu.dot_dimension_numbers<[1], [1], [0], [0], [0, 0, 1, 0], [], []>} : vector<16x256xf32>, vector<128x256xf32>, vector<16x128xf32> -> vector<16x128xf32>
    %c0_3 = arith.constant 0 : index
    %c0_4 = arith.constant 0 : index
    %3 = vector.load %arg4[%c0_3, %c0_4] : memref<1x128xf32, #tpu.memory_space<vmem>>, vector<1x128xf32>
    %cst_5 = arith.constant 2.000000e+00 : f32
    %4 = vector.broadcast %cst_5 : f32 to vector<1x128xf32>
    %5 = arith.mulf %4, %3 : vector<1x128xf32>
    %6 = vector.broadcast %5 : vector<1x128xf32> to vector<16x128xf32>
    %7 = arith.addf %2, %6 : vector<16x128xf32>
    %c0_6 = arith.constant 0 : index
    %c0_7 = arith.constant 0 : index
    %8 = vector.load %arg5[%c0_6, %c0_7] : memref<16x128xf32, #tpu.memory_space<vmem>>, vector<16x128xf32>
    tpu.vector_store %arg5[%c0_6, %c0_7], %7 {strides = array<i32>} : memref<16x128xf32, #tpu.memory_space<vmem>>, vector<16x128xf32>,
    return
  }
  func.func @transform_0(%arg0: i32, %arg1: i32) -> (i32, i32) {
    %c0_i32 = arith.constant 0 : i32
    %c0_i32_0 = arith.constant 0 : i32
    return %arg0, %c0_i32 : i32, i32
  }
  func.func @transform_1(%arg0: i32, %arg1: i32) -> (i32, i32) {
    %c0_i32 = arith.constant 0 : i32
    %c0_i32_0 = arith.constant 0 : i32
    return %arg1, %c0_i32 : i32, i32
  }
  func.func @transform_2(%arg0: i32, %arg1: i32) -> (i32, i32) {
    %c0_i32 = arith.constant 0 : i32
    %c0_i32_0 = arith.constant 0 : i32
    return %c0_i32, %arg1 : i32, i32
  }
  func.func @transform_3(%arg0: i32, %arg1: i32) -> (i32, i32) {
    %c0_i32 = arith.constant 0 : i32
    return %arg0, %arg1 : i32, i32
  }
}

</mosaic_0001>

<bundles_post_ra>
// kernel: tpu_custom_call.1
= control target key start
LH: loop header
LB: loop body
LE: loop exit
PB: predicated region body
PF: predicated region fallthrough
CT: control target
= control target key end

     0   :  { %8 = vsyncpa [#allocation3], 0  ;;  %s375_s0 = inlined_call_operand.hbm [shape: f32[16,256], index: 0, kind: input, shape index: {}]   ;;  %s376_s1 = inlined_call_operand.hbm [shape: f32[128,256], index: 1, kind: input, shape index: {}]   ;;  %s377_s2 = inlined_call_operand.vmem [shape: f32[1,128], index: 2, kind: input, shape index: {}]   ;;  %s378_s3 = inlined_call_operand.hbm [shape: f32[16,128], index: 3, kind: output, shape index: {}]  }
   0x1   :  { %9 = vsyncpa [#allocation6], 0 }
   0x2   :  { %10 = vsyncpa [#allocation4], 0  ;;  %s309_s12 = smov [#allocation2]   ;;  %s237_s16 = scalar_lea.hbm %s375_s0, 512 }
   0x3   :  { %s16_s13 = sshll.u32 %s309_s12, 4  ;;  %p238_p0 = scmp.ne.s32.totalorder %s375_s0, %s237_s16  ;;  %s17_s13 = int_to_ptr.vmem [resolvable:$true] %s16_s13 }
   0x4   :  { %p241_p1 = scmp.lt.u32.totalorder %s237_s16, %s375_s0 }
   0x6   :  { %p243_p2 = pnand %p241_p1, %p238_p0 }
   0x8   :  { %246 = shalt.err (!%p243_p2)
}
   0x9   :  { %s247_s21 = scalar_lea.vmem %s17_s13, 512  ;;  %p252_p4 = scmp.lt.s32.totalorder %s17_s13, %s17_s13 }
   0xa   :  { %p248_p3 = scmp.ne.s32.totalorder %s17_s13, %s247_s21  ;;  %p253_p5 = scmp.lt.s32.totalorder %s247_s21, %s247_s21 }
   0xc   :  { %p254_p6 = por %p253_p5, %p252_p4 }
   0xe   :  { %p255_p7 = pnand %p254_p6, %p248_p3 }
  0x10   :  { %258 = shalt.err (!%p255_p7)
}
  0x11   :  { %s310_s22 = smov 256   ;;  %s311_s23 = smov 16  }
  0x12   :  { %22 = dma.hbm_to_vmem [thread:$0]  %s375_s0, 512, %s17_s13, [#allocation3], %s310_s22, %s310_s22, %s311_s23  }
  0x13   :  { %s312_s26 = smov [#allocation5]   ;;  %s259_s30 = scalar_lea.hbm %s376_s1, 4096 }
  0x14   :  { %s28_s27 = sshll.u32 %s312_s26, 4  ;;  %p260_p8 = scmp.ne.s32.totalorder %s376_s1, %s259_s30  ;;  %s29_s27 = int_to_ptr.vmem [resolvable:$true] %s28_s27 }
  0x15   :  { %p263_p9 = scmp.lt.u32.totalorder %s259_s30, %s376_s1 }
  0x17   :  { %p265_p10 = pnand %p263_p9, %p260_p8 }
  0x19   :  { %268 = shalt.err (!%p265_p10)
}
  0x1a   :  { %s269_s8 = scalar_lea.vmem %s29_s27, 4096  ;;  %p274_p12 = scmp.lt.s32.totalorder %s29_s27, %s29_s27 }
  0x1b   :  { %p270_p11 = scmp.ne.s32.totalorder %s29_s27, %s269_s8  ;;  %p275_p13 = scmp.lt.s32.totalorder %s269_s8, %s269_s8 }
  0x1d   :  { %p276_p0 = por %p275_p13, %p274_p12 }
  0x1f   :  { %p277_p1 = pnand %p276_p0, %p270_p11 }
  0x21   :  { %280 = shalt.err (!%p277_p1)
}
  0x22   :  { %34 = dma.hbm_to_vmem [thread:$0]  %s376_s1, 4096, %s29_s27, [#allocation6], %s310_s22, %s310_s22, %s311_s23  }
  0x23   :  { %303 = dma.done.wait [#allocation3], 512  }
  0x24   :  { %304 = vsyncadd [#allocation3], 4294966784 }
  0x25   :  { %305 = dma.done.wait [#allocation6], 4096  }
  0x26   :  { %306 = vsyncadd [#allocation6], 4294963200  ;;  %v48_v0 = vld [vmem:[#allocation5 + $0x8] sm:$0xff]  ;;  %v50_v1 = vld [vmem:[#allocation5 + $0x18] sm:$0xff]  ;;  %v82_v52 = vlaneseq  ;;  %s313_s11 = smov [#allocation7]  }
  0x27   :  { %v47_v2 = vld [vmem:[#allocation5] sm:$0xff]  ;;  %v182_v3 = vpack.c.bf16 %v50_v1, %v48_v0  ;;  %v49_v4 = vld [vmem:[#allocation5 + $0x10] sm:$0xff]  ;;  %v52_v5 = vld [vmem:[#allocation5 + $0x28] sm:$0xff]  ;;  %s169_s12 = sshll.u32 %s313_s11, 4  ;;  %s170_s12 = int_to_ptr.vmem [resolvable:$true] %s169_s12 }
  0x28   :  { %v54_v6 = vld [vmem:[#allocation5 + $0x38] sm:$0xff]  ;;  %v184_v7 = vpack.c.bf16 %v49_v4, %v47_v2  ;;  %v51_v9 = vld [vmem:[#allocation5 + $0x20] sm:$0xff]  ;;  %v53_v10 = vld [vmem:[#allocation5 + $0x30] sm:$0xff]  ;;  %v83_v53 = vshrl.u32 %v82_v52, 7  ;;  %s281_s13 = scalar_lea.vmem %s170_s12, 256  ;;  %p286_p3 = scmp.lt.s32.totalorder %s170_s12, %s170_s12 }
  0x29   :  { %v186_v8 = vpack.c.bf16 %v54_v6, %v52_v5  ;;  %183 = vmatprep.subr.bf16.mxu0 %v182_v3  ;;  %214 = vmatprep.subr.bf16.mxu1 %v182_v3  ;;  %v56_v11 = vld [vmem:[#allocation5 + $0x48] sm:$0xff]  ;;  %v58_v12 = vld [vmem:[#allocation5 + $0x58] sm:$0xff]  ;;  %v188_v13 = vpack.c.bf16 %v53_v10, %v51_v9  ;;  %v55_v17 = vld [vmem:[#allocation5 + $0x40] sm:$0xff]  ;;  %p282_p2 = scmp.ne.s32.totalorder %s170_s12, %s281_s13  ;;  %p287_p4 = scmp.lt.s32.totalorder %s281_s13, %s281_s13 }
  0x2a   :  { %185 = vmatpush1.bf16.xpose.msra.mxu0 %v184_v7  ;;  %222 = vmatpush1.bf16.xpose.msra.mxu1 %v184_v7  ;;  %v190_v14 = vpack.c.bf16 %v58_v12, %v56_v11  ;;  %v44_v15 = vld [vmem:[#allocation2 + $0x8] sm:$0xff]  ;;  %v46_v16 = vld [vmem:[#allocation2 + $0x18] sm:$0xff]  ;;  %v57_v18 = vld [vmem:[#allocation5 + $0x50] sm:$0xff]  ;;  %v84_v56 = vsub.s32 0, %v83_v53 }
  0x2b   :  { %187 = vmatprep.subr.bf16.mxu0 %v186_v8  ;;  %215 = vmatprep.subr.bf16.mxu1 %v186_v8  ;;  %v60_v19 = vld [vmem:[#allocation5 + $0x68] sm:$0xff]  ;;  %v62_v20 = vld [vmem:[#allocation5 + $0x78] sm:$0xff]  ;;  %v192_v21 = vpack.c.bf16 %v57_v18, %v55_v17  ;;  %v59_v23 = vld [vmem:[#allocation5 + $0x60] sm:$0xff]  ;;  %p288_p5 = por %p287_p4, %p286_p3 }
  0x2c   :  { %151 = vmatprep.mubr.f32.mxu0 %v44_v15  ;;  %156 = vmatprep.mubr.f32.mxu1 %v46_v16  ;;  %v194_v22 = vpack.c.bf16 %v62_v20, %v60_v19  ;;  %v61_v24 = vld [vmem:[#allocation5 + $0x70] sm:$0xff]  ;;  %v64_v25 = vld [vmem:[#allocation5 + $0x88] sm:$0xff]  ;;  %v66_v26 = vld [vmem:[#allocation5 + $0x98] sm:$0xff] }
  0x2d   :  { %v196_v27 = vpack.c.bf16 %v61_v24, %v59_v23  ;;  %v198_v28 = vpack.c.bf16 %v66_v26, %v64_v25  ;;  %v63_v29 = vld [vmem:[#allocation5 + $0x80] sm:$0xff]  ;;  %v65_v30 = vld [vmem:[#allocation5 + $0x90] sm:$0xff]  ;;  %v68_v31 = vld [vmem:[#allocation5 + $0xa8] sm:$0xff]  ;;  %p289_p6 = pnand %p288_p5, %p282_p2 }
  0x2e   :  { %v70_v32 = vld [vmem:[#allocation5 + $0xb8] sm:$0xff]  ;;  %v200_v33 = vpack.c.bf16 %v65_v30, %v63_v29  ;;  %v67_v35 = vld [vmem:[#allocation5 + $0xa0] sm:$0xff]  ;;  %v69_v36 = vld [vmem:[#allocation5 + $0xb0] sm:$0xff] }
  0x2f   :  { %v202_v34 = vpack.c.bf16 %v70_v32, %v68_v31  ;;  %v72_v37 = vld [vmem:[#allocation5 + $0xc8] sm:$0xff]  ;;  %v74_v38 = vld [vmem:[#allocation5 + $0xd8] sm:$0xff]  ;;  %v204_v39 = vpack.c.bf16 %v69_v36, %v67_v35  ;;  %v71_v41 = vld [vmem:[#allocation5 + $0xc0] sm:$0xff] }
  0x30   :  { %v206_v40 = vpack.c.bf16 %v74_v38, %v72_v37  ;;  %v73_v42 = vld [vmem:[#allocation5 + $0xd0] sm:$0xff]  ;;  %v76_v43 = vld [vmem:[#allocation5 + $0xe8] sm:$0xff]  ;;  %v78_v44 = vld [vmem:[#allocation5 + $0xf8] sm:$0xff] }
  0x31   :  { %v208_v45 = vpack.c.bf16 %v73_v42, %v71_v41  ;;  %v210_v46 = vpack.c.bf16 %v78_v44, %v76_v43  ;;  %v75_v47 = vld [vmem:[#allocation5 + $0xe0] sm:$0xff]  ;;  %v77_v48 = vld [vmem:[#allocation5 + $0xf0] sm:$0xff] }
  0x32   :  { %189 = vmatpush1.bf16.xpose.msra.mxu0 %v188_v13  ;;  %223 = vmatpush1.bf16.xpose.msra.mxu1 %v188_v13  ;;  %v212_v49 = vpack.c.bf16 %v77_v48, %v75_v47  ;;  %v43_v50 = vld [vmem:[#allocation2] sm:$0xff]  ;;  %v45_v51 = vld [vmem:[#allocation2 + $0x10] sm:$0xff] }
  0x33   :  { %191 = vmatprep.subr.bf16.mxu0 %v190_v14  ;;  %216 = vmatprep.subr.bf16.mxu1 %v190_v14  ;;  %v79_v54 = vld [vmem:[%s377_s2] sm:$0x1] }
  0x34   :  { %v80_v55 = vmul.f32 2.0, %v79_v54 }
  0x36   :  { %v85_v57 = vrot.slane %v80_v55, %v84_v56 }
  0x3a   :  { %193 = vmatpush1.bf16.xpose.msra.mxu0 %v192_v21  ;;  %224 = vmatpush1.bf16.xpose.msra.mxu1 %v192_v21 }
  0x3b   :  { %195 = vmatprep.subr.bf16.mxu0 %v194_v22  ;;  %217 = vmatprep.subr.bf16.mxu1 %v194_v22 }
  0x42   :  { %197 = vmatpush1.bf16.xpose.msra.mxu0 %v196_v27  ;;  %225 = vmatpush1.bf16.xpose.msra.mxu1 %v196_v27 }
  0x43   :  { %199 = vmatprep.subr.bf16.mxu0 %v198_v28  ;;  %218 = vmatprep.subr.bf16.mxu1 %v198_v28 }
  0x4a   :  { %201 = vmatpush1.bf16.xpose.msra.mxu0 %v200_v33  ;;  %226 = vmatpush1.bf16.xpose.msra.mxu1 %v200_v33 }
  0x4b   :  { %203 = vmatprep.subr.bf16.mxu0 %v202_v34  ;;  %219 = vmatprep.subr.bf16.mxu1 %v202_v34 }
  0x52   :  { %205 = vmatpush1.bf16.xpose.msra.mxu0 %v204_v39  ;;  %227 = vmatpush1.bf16.xpose.msra.mxu1 %v204_v39 }
  0x53   :  { %207 = vmatprep.subr.bf16.mxu0 %v206_v40  ;;  %220 = vmatprep.subr.bf16.mxu1 %v206_v40 }
  0x5a   :  { %209 = vmatpush1.bf16.xpose.msra.mxu0 %v208_v45  ;;  %228 = vmatpush1.bf16.xpose.msra.mxu1 %v208_v45 }
  0x5b   :  { %211 = vmatprep.subr.bf16.mxu0 %v210_v46  ;;  %221 = vmatprep.subr.bf16.mxu1 %v210_v46 }
  0x62   :  { %213 = vmatpush1.bf16.xpose.msra.mxu0 %v212_v49  ;;  %229 = vmatpush1.bf16.xpose.msra.mxu1 %v212_v49 }
  0x69   :  { %152 = vmatmul.mubr.f32.vlgmr.msra.gmra.mrb[0].mxu0 %v43_v50  ;;  %157 = vmatmul.mubr.f32.vlgmr.msra.gmra.mrb[0].mxu1 %v45_v51 }
 0x13c   :  { %v153_v58 = vpop.f32.mrb[0].mxu0  ;;  %v158_v59 = vpop.f32.mrb[0].mxu1 }
 0x13d   :  { %v154_v60 = vadd.f32 %v153_v58, %v85_v57  ;;  %v159_v61 = vadd.f32 %v158_v59, %v85_v57  ;;  %v155_v62 = vpop.f32.mrb[1].mxu0  ;;  %v160_v63 = vpop.f32.mrb[1].mxu1 }
 0x13f   :  { %162 = vst [vmem:[#allocation7] sm:$0xff] %v154_v60  ;;  %163 = vst [vmem:[#allocation7 + $0x8] sm:$0xff] %v159_v61 }
 0x140   :  { %292 = shalt.err (!%p289_p6)
}
 0x141   :  { %s293_s15 = scalar_lea.hbm %s378_s3, 256 }
 0x142   :  { %p294_p7 = scmp.ne.s32.totalorder %s378_s3, %s293_s15  ;;  %p297_p8 = scmp.lt.u32.totalorder %s293_s15, %s378_s3 }
 0x144   :  { %p299_p9 = pnand %p297_p8, %p294_p7 }
 0x146   :  { %302 = shalt.err (!%p299_p9)
}
 0x147   :  { %s314_s20 = smov 128   ;;  %s315_s21 = smov 8  }
 0x148   :  { %175 = dma.vmem_to_hbm [thread:$0]  %s170_s12, 256, %s378_s3, [#allocation4], %s314_s20, %s314_s20, %s315_s21  }
 0x149   :  { %307 = dma.done.wait [#allocation4], 256  }
 0x14a   :  { %308 = vsyncadd [#allocation4], 4294967040 }
 0x14b   :  { %179 = vsyncpa [#allocation3], 1 }
 0x14c   :  { %180 = vsyncpa [#allocation6], 1 }
 0x14d   :  { %181 = vsyncpa [#allocation4], 1 }

</bundles_post_ra>
